<compile_context>
chip_gen: v7x
topology: tpu7x:2x2x1
jax: 0.10.0
libtpu: 0.0.40
codegen_flags: <defaults>
</compile_context>

<pallas_src>
import math

import jax
import jax.numpy as jnp
from jax.experimental import pallas as pl
from jax.experimental.pallas import tpu as pltpu

_MIB = 1024 * 1024
_MEGACORE_MIN_BYTES = 1 * _MIB  # only force a >=2-step grid above this size


def make_positional_encoding(d_model: int, max_seq_len: int = 80) -> jnp.ndarray:
    """Reproduces the PyTorch buffer exactly.

    NOTE: the original module uses math.log(1000) (not the canonical 10000);
    this is intentional to match the PyTorch source -- do not "fix" it.
    """
    den = jnp.exp(-jnp.arange(0, d_model, 2, dtype=jnp.float32)
                  * math.log(1000.0) / d_model)                        # (d_model//2,)
    pos = jnp.arange(0, max_seq_len, dtype=jnp.float32).reshape(max_seq_len, 1)
    ang = pos * den                                                     # (max_seq_len, d_model//2)
    pe = jnp.zeros((max_seq_len, d_model), dtype=jnp.float32)
    pe = pe.at[:, 1::2].set(jnp.cos(ang))
    pe = pe.at[:, 0::2].set(jnp.sin(ang))
    return pe                                                           # (max_seq_len, d_model)


def _pe_add_kernel(x_ref, pe_ref, o_ref):
    # 3-D path: x/o/pe tiles are all (ts, D)   -> congruent VPU add.
    # flat path: x/o are (tb, tl), pe is (1, tl) -> sublane broadcast.
    o_ref[...] = x_ref[...] + pe_ref[...]


# ----------------------------- sizing helpers ------------------------------

def _vmem_capacity_bytes() -> int:
    try:
        return int(pltpu.get_tpu_info().vmem_capacity_bytes)
    except Exception:
        # Conservative fallback = v7x physical VMEM per TensorCore.
        return 64 * _MIB


def _budgets():
    cap = _vmem_capacity_bytes()
    # Per-x-tile target ~ cap/16: 4 MiB on v7x (64 MiB VMEM), 8 MiB on
    # v5e/v6e (128 MiB).  Resident working set is roughly 4 tiles
    # (x-in x2 + out x2, double-buffered) plus a small pe tile.
    target_tile = max(2 * _MIB, cap // 16)
    # Scoped-VMEM limit: 48 MiB on v7x, 64 MiB on v5e/v6e, never below 32 MiB.
    vmem_limit = max(32 * _MIB, min(cap - 16 * _MIB, 64 * _MIB))
    return target_tile, vmem_limit


def _compiler_params(vmem_limit):
    return pltpu.CompilerParams(
        dimension_semantics=("parallel", "parallel"),
        vmem_limit_bytes=vmem_limit,
    )


# ------------------------------- kernel paths ------------------------------

def _forward_3d(x, pe_sd, target_tile, vmem_limit):
    """3-D blocking: grid (B, S//ts); x block (None, ts, D), pe block (ts, D).

    Last block dim is the full D extent (legal for any D); sublane axis = seq
    tile (multiple of 8 or full S), so vregs stay sublane-dense even at tiny
    batch and the pe tile is congruent with the x tile (no broadcast).
    """
    B, S, D = x.shape
    itemsize = jnp.dtype(x.dtype).itemsize
    row_bytes = D * itemsize

    max_ts = max(8, (target_tile // row_bytes) // 8 * 8)
    ts = S if S <= max_ts else max_ts           # full extent, or a multiple of 8

    # Megacore: if the whole tensor would be a single grid step, split seq.
    if B == 1 and pl.cdiv(S, ts) == 1 and B * S * D * itemsize >= _MEGACORE_MIN_BYTES:
        half = (S // 2 // 8) * 8
        if half >= 8:
            ts = half

    grid = (B, pl.cdiv(S, ts))
    out = pl.pallas_call(
        _pe_add_kernel,
        out_shape=jax.ShapeDtypeStruct((B, S, D), x.dtype),
        grid=grid,
        in_specs=[
            pl.BlockSpec((None, ts, D), lambda b, j: (b, j, 0)),   # x tile (batch squeezed)
            pl.BlockSpec((ts, D), lambda b, j: (j, 0)),            # pe tile (shared over batch)
        ],
        out_specs=pl.BlockSpec((None, ts, D), lambda b, j: (b, j, 0)),
        input_output_aliases={0: 0},   # op is x += pe; reuses x's buffer if donated
        compiler_params=_compiler_params(vmem_limit),
    )(x, pe_sd)
    return out


def _forward_flat(x, pe_sd, target_tile, vmem_limit):
    """Flattened (B, S*D) path (fallback for D % 128 != 0).

    Returns None if a safe tile cannot be formed (caller falls back to 3-D).
    """
    B, S, D = x.shape
    L = S * D
    itemsize = jnp.dtype(x.dtype).itemsize

    x_flat = x.reshape(B, L)
    pe_flat = pe_sd.reshape(1, L)

    # Sublane tile over batch rows: multiple of 8, or the full extent.
    tb = min(B, 256) if B % 8 == 0 else B

    if L % 128 == 0:
        max_lanes = max(128, (target_tile // (itemsize * tb)) // 128 * 128)
        tl = min(L, max_lanes)
        # Megacore: force >=2 grid steps for mid-size tensors.
        if (pl.cdiv(B, tb) * pl.cdiv(L, tl) == 1
                and B * L * itemsize >= _MEGACORE_MIN_BYTES
                and L % 256 == 0):
            tl = L // 2
    else:
        # Non-128-aligned L: last dim must be the full extent; bound the tile
        # by shrinking the sublane (batch) tile instead.
        tl = L
        if B % 8 == 0:
            tb = max(8, min(tb, (target_tile // (itemsize * L)) // 8 * 8))
        # Safety guard: never let the pipelined working set exceed the budget.
        if tb * tl * itemsize * 4 + 2 * tl * itemsize > vmem_limit:
            return None

    grid = (pl.cdiv(B, tb), pl.cdiv(L, tl))
    out_flat = pl.pallas_call(
        _pe_add_kernel,
        out_shape=jax.ShapeDtypeStruct((B, L), x.dtype),
        grid=grid,
        in_specs=[
            pl.BlockSpec((tb, tl), lambda i, j: (i, j)),   # x tile
            pl.BlockSpec((1, tl), lambda i, j: (0, j)),    # pe tile (shared over rows)
        ],
        out_specs=pl.BlockSpec((tb, tl), lambda i, j: (i, j)),
        input_output_aliases={0: 0},
        compiler_params=_compiler_params(vmem_limit),
    )(x_flat, pe_flat)
    return out_flat.reshape(B, S, D)


def positional_encoder_forward(x: jnp.ndarray, pe: jnp.ndarray) -> jnp.ndarray:
    """x: (B, S, D); pe: (max_seq_len, D). Returns x + pe[:S] broadcast over batch."""
    B, S, D = x.shape
    max_seq_len, d_model = pe.shape
    assert D == d_model, f"d_model mismatch: x has {D}, pe has {d_model}"
    assert S <= max_seq_len, f"seq_len {S} exceeds max_seq_len {max_seq_len}"

    # Glue (layout plumbing, free): slice/cast the table once in the wrapper.
    pe_sd = pe[:S, :].astype(x.dtype)
    target_tile, vmem_limit = _budgets()

    if D % 128 == 0:
        # Lane-dense 3-D blocking (e.g. the module's d_model=512).
        return _forward_3d(x, pe_sd, target_tile, vmem_limit)

    out = _forward_flat(x, pe_sd, target_tile, vmem_limit)
    if out is None:
        # Awkward shape (large, non-128-aligned S*D): bounded 3-D tiles instead.
        out = _forward_3d(x, pe_sd, target_tile, vmem_limit)
    return out


if __name__ == "__main__":
    # Small shapes consistent with the module's forward: (batch, seq, d_model).
    B, S, D = 2, 8, 32
    MAX_SEQ_LEN = 16

    key = jax.random.PRNGKey(0)
    x = jax.random.normal(key, (B, S, D), dtype=jnp.float32)
    pe = make_positional_encoding(D, MAX_SEQ_LEN)

    out = jax.block_until_ready(positional_encoder_forward(x, pe))
    ref = x + pe[None, :S, :]
    assert out.shape == (B, S, D)
    assert jnp.allclose(out, ref, atol=1e-6), "mismatch vs reference (small case)"

    # Second check at the module's actual d_model=512 (exercises the 3-D path).
    B2, S2, D2 = 2, 16, 512
    x2 = jax.random.normal(jax.random.PRNGKey(1), (B2, S2, D2), dtype=jnp.float32)
    pe2 = make_positional_encoding(D2, 80)
    out2 = jax.block_until_ready(positional_encoder_forward(x2, pe2))
    ref2 = x2 + pe2[None, :S2, :]
    assert jnp.allclose(out2, ref2, atol=1e-6), "mismatch vs reference (d_model=512)"

    print("KERNEL_OK")
</pallas_src>

<mosaic_0001>
module attributes {stable_mosaic.version = 11 : i64} {
  func.func @_pe_add_kernel(%arg0: i32, %arg1: i32, %arg2: memref<2x256xf32, #tpu.memory_space<vmem>>, %arg3: memref<1x256xf32, #tpu.memory_space<vmem>>, %arg4: memref<2x256xf32, #tpu.memory_space<vmem>>) attributes {dimension_semantics = [#tpu.dimension_semantics<parallel>, #tpu.dimension_semantics<parallel>], iteration_bounds = array<i64: 1, 1>, scalar_prefetch = 0 : i64, scratch_operands = 0 : i64, tpu.core_type = #tpu.core_type<tc>, window_params = [{transform_indices = @transform_0, window_bounds = array<i64: 2, 256>}, {transform_indices = @transform_1, window_bounds = array<i64: 1, 256>}, {transform_indices = @transform_2, window_bounds = array<i64: 2, 256>}]} {
    %c0 = arith.constant 0 : index
    %c0_0 = arith.constant 0 : index
    %0 = vector.load %arg2[%c0, %c0_0] : memref<2x256xf32, #tpu.memory_space<vmem>>, vector<2x256xf32>
    %c0_1 = arith.constant 0 : index
    %c0_2 = arith.constant 0 : index
    %1 = vector.load %arg3[%c0_1, %c0_2] : memref<1x256xf32, #tpu.memory_space<vmem>>, vector<1x256xf32>
    %2 = vector.broadcast %1 : vector<1x256xf32> to vector<2x256xf32>
    %3 = arith.addf %0, %2 : vector<2x256xf32>
    %c0_3 = arith.constant 0 : index
    %c0_4 = arith.constant 0 : index
    %4 = vector.load %arg4[%c0_3, %c0_4] : memref<2x256xf32, #tpu.memory_space<vmem>>, vector<2x256xf32>
    tpu.vector_store %arg4[%c0_3, %c0_4], %3 {strides = array<i32>} : memref<2x256xf32, #tpu.memory_space<vmem>>, vector<2x256xf32>,
    return
  }
  func.func @transform_0(%arg0: i32, %arg1: i32) -> (i32, i32) {
    %c0_i32 = arith.constant 0 : i32
    return %arg0, %arg1 : i32, i32
  }
  func.func @transform_1(%arg0: i32, %arg1: i32) -> (i32, i32) {
    %c0_i32 = arith.constant 0 : i32
    %c0_i32_0 = arith.constant 0 : i32
    return %c0_i32, %arg1 : i32, i32
  }
  func.func @transform_2(%arg0: i32, %arg1: i32) -> (i32, i32) {
    %c0_i32 = arith.constant 0 : i32
    return %arg0, %arg1 : i32, i32
  }
}

</mosaic_0001>

<bundles_post_ra>
// kernel: tpu_custom_call.1
= control target key start
LH: loop header
LB: loop body
LE: loop exit
PB: predicated region body
PF: predicated region fallthrough
CT: control target
= control target key end

     0   :  { %7 = vsyncpa [#allocation3], 0  ;;  %s157_s0 = inlined_call_operand.hbm [shape: f32[2,256], index: 0, kind: input, shape index: {}, may-alias: {0,2}]   ;;  %s158_s1 = inlined_call_operand.vmem [shape: f32[1,256], index: 1, kind: input, shape index: {}]   ;;  %s159_s2 = inlined_call_operand.hbm [shape: f32[2,256], index: 2, kind: output, shape index: {}, may-alias: {0,2}]  }
   0x1   :  { %8 = vsyncpa [#allocation4], 0  ;;  %s112_s9 = smov [#allocation2]   ;;  %s64_s13 = scalar_lea.hbm %s157_s0, 64 }
   0x2   :  { %s15_s10 = sshll.u32 %s112_s9, 4  ;;  %p65_p0 = scmp.ne.s32.totalorder %s157_s0, %s64_s13  ;;  %s16_s10 = int_to_ptr.vmem [resolvable:$true] %s15_s10 }
   0x3   :  { %p68_p1 = scmp.lt.u32.totalorder %s64_s13, %s157_s0 }
   0x5   :  { %p70_p2 = pnand %p68_p1, %p65_p0 }
   0x7   :  { %73 = shalt.err (!%p70_p2)
}
   0x8   :  { %s74_s18 = scalar_lea.vmem %s16_s10, 64  ;;  %p79_p4 = scmp.lt.s32.totalorder %s16_s10, %s16_s10 }
   0x9   :  { %p75_p3 = scmp.ne.s32.totalorder %s16_s10, %s74_s18  ;;  %p80_p5 = scmp.lt.s32.totalorder %s74_s18, %s74_s18 }
   0xb   :  { %p81_p6 = por %p80_p5, %p79_p4 }
   0xd   :  { %p82_p7 = pnand %p81_p6, %p75_p3 }
   0xf   :  { %85 = shalt.err (!%p82_p7)
}
  0x10   :  { %18 = dma.hbm_to_vmem [thread:$0]  %s157_s0, 64, %s16_s10, [#allocation3]  }
  0x11   :  { %108 = dma.done.wait [#allocation3], 64  }
  0x12   :  { %109 = vsyncadd [#allocation3], 4294967232  ;;  %v27_v0 = vlaneseq  ;;  %v113_v1 = vmov 1983009808   ;;  %v25_v7 = vld [vmem:[%s158_s1] sm:$0x3] }
  0x13   :  { %v37_v2 = vunpack.c.l.s4 %v113_v1  ;;  %v24_v12 = vld [vmem:[#allocation2] sm:$0xf]  ;;  %s114_s23 = smov [#allocation5]  }
  0x14   :  { %v28_v3 = vshrl.u32 %v27_v0, 7  ;;  %s52_s0 = sshll.u32 %s114_s23, 4  ;;  %s53_s0 = int_to_ptr.vmem [resolvable:$true] %s52_s0 }
  0x15   :  { %v38_v6 = vunpack.c.0.s8 %v37_v2  ;;  %s86_s24 = scalar_lea.vmem %s53_s0, 64  ;;  %p91_p9 = scmp.lt.s32.totalorder %s53_s0, %s53_s0 }
  0x16   :  { %v29_v4 = vsub.s32 0, %v28_v3  ;;  %v33_v5 = vsub.s32 1, %v28_v3  ;;  %p87_p8 = scmp.ne.s32.totalorder %s53_s0, %s86_s24  ;;  %p92_p10 = scmp.lt.s32.totalorder %s86_s24, %s86_s24 }
  0x17   :  { %v41_v10 = vsub.s32 %v38_v6, %v28_v3 }
  0x18   :  { %v30_v8 = vrot.slane %v25_v7, %v29_v4  ;;  %v34_v9 = vrot.slane %v25_v7, %v33_v5  ;;  %p93_p11 = por %p92_p10, %p91_p9 }
  0x1a   :  { %v35_v11 = vcombine.low %v30_v8, %v34_v9  ;;  %p94_p12 = pnand %p93_p11, %p87_p8 }
  0x1c   :  { %v42_v13 = vrot.slane %v35_v11, %v41_v10 }
  0x1e   :  { %v44_v14 = vadd.f32 %v42_v13, %v24_v12 }
  0x20   :  { %45 = vst [vmem:[#allocation5] sm:$0xf] %v44_v14 }
  0x21   :  { %97 = shalt.err (!%p94_p12)
}
  0x22   :  { %s98_s26 = scalar_lea.hbm %s159_s2, 64 }
  0x23   :  { %p99_p13 = scmp.ne.s32.totalorder %s159_s2, %s98_s26  ;;  %p102_p0 = scmp.lt.u32.totalorder %s98_s26, %s159_s2 }
  0x25   :  { %p104_p1 = pnand %p102_p0, %p99_p13 }
  0x27   :  { %107 = shalt.err (!%p104_p1)
}
  0x28   :  { %55 = dma.vmem_to_hbm [thread:$0]  %s53_s0, 64, %s159_s2, [#allocation4]  }
  0x29   :  { %110 = dma.done.wait [#allocation4], 64  }
  0x2a   :  { %111 = vsyncadd [#allocation4], 4294967232 }
  0x2b   :  { %59 = vsyncpa [#allocation3], 1 }
  0x2c   :  { %60 = vsyncpa [#allocation4], 1 }

</bundles_post_ra>
